<compile_context>
chip_gen: v6e
topology: v6e:2x2x1
jax: 0.10.0
libtpu: 0.0.40
codegen_flags: <defaults>
</compile_context>

<pallas_src>
import math

import jax
import jax.numpy as jnp
from jax.experimental import pallas as pl
from jax.experimental.pallas import tpu as pltpu


def _round_up(x, m):
    return ((x + m - 1) // m) * m


def _time_embed_kernel(x_ref, w_ref, o_ref):
    # x_ref: (tm, 1) f32, w_ref: (1, half) f32, o_ref: (tm, 2*half) f32
    proj = x_ref[...] * w_ref[...] * (2.0 * math.pi)          # broadcast -> (tm, half)
    o_ref[...] = jnp.concatenate([jnp.sin(proj), jnp.cos(proj)], axis=-1)


def time_embedding(x, W):
    """Pallas TimeEmbedding.forward.

    x: (B,) f32 time steps; W: (embed_dim // 2,) f32 frozen frequencies.
    Returns (B, embed_dim) f32 = concat([sin(x*W*2pi), cos(x*W*2pi)], -1).
    """
    B = x.shape[0]
    half = W.shape[0]
    embed_dim = 2 * half

    tm = min(512, _round_up(B, 8))          # batch tile (sublane-aligned)
    grid = (pl.cdiv(B, tm),)                # edge block masked by Pallas, no padding

    return pl.pallas_call(
        _time_embed_kernel,
        out_shape=jax.ShapeDtypeStruct((B, embed_dim), jnp.float32),
        grid=grid,
        in_specs=[
            pl.BlockSpec((tm, 1), lambda i: (i, 0)),       # time values, tiled on batch
            pl.BlockSpec((1, half), lambda i: (0, 0)),     # frequencies, resident
        ],
        out_specs=pl.BlockSpec((tm, embed_dim), lambda i: (i, 0)),  # lane-dense store
        compiler_params=pltpu.CompilerParams(
            dimension_semantics=("parallel",),
        ),
    )(x.reshape(B, 1).astype(jnp.float32), W.reshape(1, half).astype(jnp.float32))


def time_embedding_ref(x, W):
    proj = x[:, None] * W[None, :] * (2.0 * math.pi)
    return jnp.concatenate([jnp.sin(proj), jnp.cos(proj)], axis=-1)


if __name__ == "__main__":
    B = 2
    embed_dim = 128          # tdim used by the surrounding UNet (32 * 4)
    scale = 30.0

    key = jax.random.PRNGKey(0)
    kw, kx = jax.random.split(key)
    # Frozen parameter: W = randn(embed_dim // 2) * scale
    W = jax.random.normal(kw, (embed_dim // 2,), jnp.float32) * scale
    # Time steps (diffusion-style, t in [0, 1))
    t = jax.random.uniform(kx, (B,), jnp.float32)

    out = jax.jit(time_embedding)(t, W)
    out = jax.block_until_ready(out)

    assert out.shape == (B, embed_dim), out.shape
    assert bool(jnp.all(jnp.isfinite(out)))
    ref = time_embedding_ref(t, W)
    # sin/cos of large arguments (|W|*2*pi up to ~7e2) lose a few ulps to f32
    # range reduction; allow a small absolute tolerance on unit-bounded values.
    max_err = float(jnp.max(jnp.abs(out - ref)))
    assert max_err < 5e-3, max_err
    print("KERNEL_OK")
</pallas_src>

<mosaic_0001>
module attributes {stable_mosaic.version = 11 : i64} {
  func.func @_time_embed_kernel(%arg0: i32, %arg1: memref<8x1xf32, #tpu.memory_space<vmem>>, %arg2: memref<1x64xf32, #tpu.memory_space<vmem>>, %arg3: memref<8x128xf32, #tpu.memory_space<vmem>>) attributes {dimension_semantics = [#tpu.dimension_semantics<parallel>], iteration_bounds = array<i64: 1>, scalar_prefetch = 0 : i64, scratch_operands = 0 : i64, tpu.core_type = #tpu.core_type<tc>, window_params = [{transform_indices = @transform_0, window_bounds = array<i64: 8, 1>}, {pipeline_mode = #tpu.pipeline_mode<synchronous>, transform_indices = @transform_1, window_bounds = array<i64: 1, 64>}, {transform_indices = @transform_2, window_bounds = array<i64: 8, 128>}]} {
    %c0 = arith.constant 0 : index
    %c0_0 = arith.constant 0 : index
    %0 = vector.load %arg1[%c0, %c0_0] : memref<8x1xf32, #tpu.memory_space<vmem>>, vector<8x1xf32>
    %c0_1 = arith.constant 0 : index
    %c0_2 = arith.constant 0 : index
    %1 = vector.load %arg2[%c0_1, %c0_2] : memref<1x64xf32, #tpu.memory_space<vmem>>, vector<1x64xf32>
    %2 = vector.broadcast %0 : vector<8x1xf32> to vector<8x64xf32>
    %3 = vector.broadcast %1 : vector<1x64xf32> to vector<8x64xf32>
    %4 = arith.mulf %2, %3 : vector<8x64xf32>
    %cst = arith.constant 6.28318548 : f32
    %5 = vector.broadcast %cst : f32 to vector<8x64xf32>
    %6 = arith.mulf %4, %5 : vector<8x64xf32>
    %7 = math.sin %6 : vector<8x64xf32>
    %8 = math.cos %6 : vector<8x64xf32>
    %9 = tpu.concatenate %7, %8 in 1 : vector<8x64xf32>, vector<8x64xf32> -> vector<8x128xf32>
    %c0_3 = arith.constant 0 : index
    %c0_4 = arith.constant 0 : index
    %10 = vector.load %arg3[%c0_3, %c0_4] : memref<8x128xf32, #tpu.memory_space<vmem>>, vector<8x128xf32>
    tpu.vector_store %arg3[%c0_3, %c0_4], %9 {strides = array<i32>} : memref<8x128xf32, #tpu.memory_space<vmem>>, vector<8x128xf32>,
    return
  }
  func.func @transform_0(%arg0: i32) -> (i32, i32) {
    %c0_i32 = arith.constant 0 : i32
    %c0_i32_0 = arith.constant 0 : i32
    return %arg0, %c0_i32 : i32, i32
  }
  func.func @transform_1(%arg0: i32) -> (i32, i32) {
    %c0_i32 = arith.constant 0 : i32
    %c0_i32_0 = arith.constant 0 : i32
    %c0_i32_1 = arith.constant 0 : i32
    return %c0_i32, %c0_i32_0 : i32, i32
  }
  func.func @transform_2(%arg0: i32) -> (i32, i32) {
    %c0_i32 = arith.constant 0 : i32
    %c0_i32_0 = arith.constant 0 : i32
    return %arg0, %c0_i32 : i32, i32
  }
}

</mosaic_0001>

<bundles_post_ra>
// kernel: time_embedding.1
= control target key start
LH: loop header
LB: loop body
LE: loop exit
PB: predicated region body
PF: predicated region fallthrough
CT: control target
= control target key end

     0   :  { %v308_v1 = vmov 0   ;;  %s364_s0 = inlined_call_operand.vmem [shape: f32[2,1], index: 0, kind: input, shape index: {}]   ;;  %s365_s1 = inlined_call_operand.vmem [shape: f32[1,64], index: 1, kind: input, shape index: {}]   ;;  %s366_s2 = inlined_call_operand.hbm [shape: f32[2,128], index: 2, kind: output, shape index: {}]  }
   0x1   :  { %v12_v0 = vld [vmem:[%s364_s0] sm:$0xff]  ;;  %281 = vset.pattern.permute.xlu0 %v308_v1 }
   0x2   :  { %7 = vsyncpa [#allocation3], 0  ;;  %16 = vperm.xlu0 %281, %v12_v0   ;;  %v257_v2 = vld [vmem:[%s365_s1] ss:$0 sm:$0xff]  ;;  %v309_v17 = vmov 2102212464  }
   0x3   :  { %v310_v19 = vmov 920167782   ;;  %v311_v23 = vmov 1326507024   ;;  %v312_v25 = vmov 683565275  }
   0x4   :  { %v313_v27 = vmov 2475754826   ;;  %v314_v30 = vmov 2131351028   ;;  %s315_s0 = smov 64  }
  0x7d   :  { %v17_v3 = vpop.permute.xlu0 %16 }
  0x7e   :  { %v25_v4 = vmul.f32 %v257_v2, %v17_v3 }
  0x80   :  { %v340_v5 = vmul.f32 6.2831855, %v25_v4 }
  0x82   :  { %v30_v6 = vand.u32 2139095040, %v340_v5  ;;  %v27_v7 = vand.u32 2147483647, %v340_v5  ;;  %vm29_vm7 = vcmp.lt.s32.totalorder %v340_v5, 0  ;;  %vm119_vm15 = vweird.f32 %v340_v5 }
  0x84   :  { %v31_v8 = vshrl.u32 %v30_v6, 23  ;;  %v34_v10 = vand.u32 8388607, %v27_v7  ;;  %vm28_vm8 = vcmp.le.f32.partialorder %v27_v7, 0.7853982 }
  0x86   :  { %v258_v9 = vadd.s32 4294967169, %v31_v8  ;;  %v35_v13 = vor.u32 8388608, %v34_v10 }
  0x88   :  { %v37_v11 = vadd.s32 1, %v258_v9  ;;  %v75_v21 = vshll.u32 %v35_v13, 8 }
  0x8a   :  { %vm38_vm0 = vcmp.gt.s32.totalorder %v37_v11, 0 }
  0x8b   :  { %v39_v12 = vsel %vm38_vm0, %v37_v11, 0  ;;  %vm238_vm0 = vcmask 523264  }
  0x8c   :  { %v41_v14 = vand.u32 31, %v39_v12  ;;  %v40_v15 = vshrl.u32 %v39_v12, 5 }
  0x8e   :  { %v42_v16 = vsub.s32 32, %v41_v14  ;;  %v53_v18 = vshll.u32 %v309_v17, %v41_v14  ;;  %v56_v20 = vshll.u32 %v310_v19, %v41_v14  ;;  %v44_v26 = vshll.u32 %v312_v25, %v41_v14 }
  0x8f   :  { %v47_v29 = vshll.u32 %v313_v27, %v41_v14  ;;  %v50_v32 = vshll.u32 %v314_v30, %v41_v14  ;;  %vm62_vm1 = vcmp.lt.s32.totalorder %v40_v15, 4  ;;  %vm59_vm2 = vcmp.lt.s32.totalorder %v40_v15, 1 }
  0x90   :  { %v54_v22 = vshrl.u32 %v310_v19, %v42_v16  ;;  %v57_v24 = vshrl.u32 %v311_v23, %v42_v16  ;;  %v45_v28 = vshrl.u32 %v313_v27, %v42_v16  ;;  %v48_v31 = vshrl.u32 %v314_v30, %v42_v16 }
  0x91   :  { %v51_v33 = vshrl.u32 %v309_v17, %v42_v16  ;;  %v43_v37 = vshrl.u32 %v312_v25, %v42_v16  ;;  %vm60_vm3 = vcmp.lt.s32.totalorder %v40_v15, 2  ;;  %vm61_vm4 = vcmp.lt.s32.totalorder %v40_v15, 3 }
  0x92   :  { %v55_v34 = vor.u32 %v54_v22, %v53_v18  ;;  %v58_v35 = vor.u32 %v57_v24, %v56_v20  ;;  %v46_v36 = vor.u32 %v45_v28, %v44_v26  ;;  %v49_v38 = vor.u32 %v48_v31, %v47_v29 }
  0x93   :  { %v52_v39 = vor.u32 %v51_v33, %v50_v32 }
  0x94   :  { %v68_v40 = vsel %vm62_vm1, %v55_v34, 920167782  ;;  %v72_v41 = vsel %vm62_vm1, %v58_v35, 1326507024  ;;  %v67_v43 = vsel %vm59_vm2, %v46_v36, %v49_v38  ;;  %v63_v46 = vsel %vm59_vm2, %v43_v37, %v46_v36 }
  0x95   :  { %v64_v42 = vsel %vm62_vm1, %v52_v39, 2102212464  ;;  %v69_v44 = vsel %vm61_vm4, %v52_v39, %v68_v40  ;;  %v71_v45 = vsel %vm59_vm2, %v49_v38, %v52_v39  ;;  %v73_v49 = vsel %vm61_vm4, %v55_v34, %v72_v41 }
  0x96   :  { %v65_v47 = vsel %vm61_vm4, %v49_v38, %v64_v42  ;;  %v70_v48 = vsel %vm60_vm3, %v67_v43, %v69_v44  ;;  %v74_v50 = vsel %vm60_vm3, %v71_v45, %v73_v49 }
  0x97   :  { %v346_v51 = vmul.u32.u64.low %v75_v21, %v70_v48  ;;  %v347_v52 = vmul.u32.u64.high %v75_v21, %v70_v48, %v346_v51  ;;  %v349_v53 = vmul.u32.u64.low %v75_v21, %v74_v50  ;;  %v350_v54 = vmul.u32.u64.high %v75_v21, %v74_v50, %v349_v53 }
  0x98   :  { %v66_v55 = vsel %vm60_vm3, %v63_v46, %v65_v47 }
  0x99   :  { %v85_v56 = vadd.s32 1, %v347_v52  ;;  %v82_v57 = vmul.u32 %v75_v21, %v66_v55  ;;  %vm84_vm5 = vc.u32 %v350_v54, %v346_v51  ;;  %v83_v6 = vadd.s32 %v346_v51, %v350_v54 }
  0x9b   :  { %v86_v58 = vsel %vm84_vm5, %v85_v56, %v347_v52 }
  0x9c   :  { %v87_v59 = vadd.s32 %v86_v58, %v82_v57 }
  0x9e   :  { %v88_v60 = vadd.s32 536870912, %v87_v59 }
  0xa0   :  { %v89_v61 = vshrl.u32 %v88_v60, 30 }
  0xa2   :  { %v90_v62 = vshll.u32 %v89_v61, 30  ;;  %v113_v20 = vsub.s32 4, %v89_v61 }
  0xa4   :  { %v91_v63 = vsub.s32 %v87_v59, %v90_v62  ;;  %v114_v23 = vsel %vm29_vm7, %v113_v20, %v89_v61 }
  0xa5   :  { %v116_v24 = vsel %vm28_vm8, 0, %v114_v23 }
  0xa6   :  { %v93_v0 = vsub.s32 0, %v91_v63  ;;  %v120_v25 = vadd.s32 3, %v116_v24  ;;  %v224_v27 = vand.u32 3, %v116_v24 }
  0xa8   :  { %v259_v1 = vmin.u32 %v93_v0, %v91_v63  ;;  %v121_v26 = vand.u32 3, %v120_v25  ;;  %vm229_vm10 = vcmp.eq.s32.totalorder %v224_v27, 2  ;;  %vm226_vm12 = vcmp.eq.s32.totalorder %v224_v27, 0 }
  0xa9   :  { %vm225_vm14 = vcmp.lt.s32.totalorder %v224_v27, 2 }
  0xaa   :  { %v95_v2 = vclz %v259_v1  ;;  %vm126_vm9 = vcmp.eq.s32.totalorder %v121_v26, 2  ;;  %vm123_vm11 = vcmp.eq.s32.totalorder %v121_v26, 0  ;;  %vm122_vm13 = vcmp.lt.s32.totalorder %v121_v26, 2 }
  0xac   :  { %v260_v3 = vadd.s32 4294967294, %v95_v2 }
  0xae   :  { %vm261_vm6 = vcmp.lt.s32.totalorder %v260_v3, 0 }
  0xaf   :  { %v98_v4 = vsel %vm261_vm6, 0, %v260_v3 }
  0xb0   :  { %v99_v8 = vsub.s32 32, %v98_v4  ;;  %v103_v9 = vsub.s32 4294967266, %v98_v4  ;;  %v100_v10 = vshll.u32 %v91_v63, %v98_v4 }
  0xb2   :  { %v101_v11 = vshrl.u32 %v83_v6, %v99_v8  ;;  %v104_v12 = vadd.s32 127, %v103_v9 }
  0xb4   :  { %v102_v13 = vor.u32 %v101_v11, %v100_v10  ;;  %v105_v14 = vshll.u32 %v104_v12, 23 }
  0xb6   :  { %v106_v15 = vor.u32 4788187, %v105_v14  ;;  %v109_v17 = vcvt.s32.f32 %v102_v13 }
  0xb8   :  { %v107_v16 = vand.u32 2147483647, %v106_v15 }
  0xba   :  { %v110_v18 = vmul.f32 %v109_v17, %v107_v16 }
  0xbc   :  { %v111_v19 = vxor.u32 2147483648, %v110_v18 }
  0xbe   :  { %v112_v21 = vsel %vm29_vm7, %v111_v19, %v110_v18 }
  0xbf   :  { %v115_v22 = vsel %vm28_vm8, %v340_v5, %v112_v21 }
  0xc0   :  { %282 = vcosq.f32 %v115_v22 }
  0xc1   :  { %284 = vsinq.f32 %v115_v22 }
  0xcd   :  { %v283_v28 = vpop.eup %282 }
  0xce   :  { %v285_v29 = vpop.eup %284  ;;  %v127_v30 = vxor.u32 2147483648, %v283_v28 }
  0xcf   :  { %v124_v31 = vxor.u32 2147483648, %v285_v29 }
  0xd0   :  { %v231_v32 = vsel %vm229_vm10, %v127_v30, %v285_v29  ;;  %v128_v7 = vsel %vm126_vm9, %v127_v30, %v285_v29 }
  0xd1   :  { %v228_v33 = vsel %vm226_vm12, %v283_v28, %v124_v31  ;;  %v125_v34 = vsel %vm123_vm11, %v283_v28, %v124_v31 }
  0xd2   :  { %v232_v35 = vsel %vm225_vm14, %v228_v33, %v231_v32  ;;  %v129_v36 = vsel %vm122_vm13, %v125_v34, %v128_v7 }
  0xd3   :  { %v233_v37 = vsel %vm119_vm15, nan, %v232_v35  ;;  %v130_v38 = vsel %vm119_vm15, nan, %v129_v36 }
  0xd4   :  { %235 = vrot.lane.b32.xlu0 %v233_v37, %s315_s0 }
 0x146   :  { %v236_v39 = vpop.permute.xlu0 %235 }
 0x147   :  { %v239_v40 = vsel %vm238_vm0, %v130_v38, %v236_v39 }
 0x148   :  { %240 = vst [vmem:[#allocation2] sm:$0xff] %v239_v40 }
 0x149   :  { %245 = vsyncadd [#allocation3], 96  ;;  %s316_s1 = smov [#allocation2]  }
 0x14a   :  { %s246_s13 = sshll.u32 %s316_s1, 4  ;;  %s247_s13 = int_to_ptr.vmem [resolvable:$true] %s246_s13 }
 0x14b   :  { %s286_s14 = scalar_lea.vmem %s247_s13, 32  ;;  %s290_s15 = scalar_lea.vmem %s247_s13, 128 }
 0x14c   :  { %p287_p0 = scmp.ne.s32.totalorder %s247_s13, %s286_s14  ;;  %p291_p1 = scmp.lt.s32.totalorder %s247_s13, %s247_s13 }
 0x14d   :  { %p292_p2 = scmp.lt.s32.totalorder %s290_s15, %s286_s14 }
 0x14f   :  { %p293_p3 = por %p292_p2, %p291_p1 }
 0x151   :  { %p294_p4 = pnand %p293_p3, %p287_p0 }
 0x153   :  { %297 = shalt.err (!%p294_p4)
}
 0x154   :  { %s317_s16 = smov 32   ;;  %s318_s17 = smov 2  }
 0x155   :  { %252 = dma.vmem_to_hbm [thread:$0]  %s247_s13, 32, %s366_s2, [#allocation3], %s317_s16, %s317_s16, %s318_s17  }
 0x156   :  { %306 = dma.done.wait [#allocation3], 128  }
 0x157   :  { %307 = vsyncadd [#allocation3], 4294967168 }
 0x158   :  { %256 = vsyncpa [#allocation3], 1 }

</bundles_post_ra>
